<compile_context>
chip_gen: v6e
topology: v6e:2x2x1
jax: 0.10.0
libtpu: 0.0.40
codegen_flags: <defaults>
</compile_context>

<pallas_src>
import math

import jax
import jax.numpy as jnp
from jax.experimental import pallas as pl
from jax.experimental.pallas import tpu as pltpu


def _round_up(x, m):
    return (x + m - 1) // m * m


def _downsample_kernel(x_ref, w_ref, o_ref):
    # x_ref: (TM, 4C), w_ref: (4C, C), o_ref: (TM, C)
    # Straight (M,K)@(K,N) matmul -> MXU, f32 accumulation.
    o_ref[...] = jnp.dot(
        x_ref[...], w_ref[...], preferred_element_type=jnp.float32
    ).astype(o_ref.dtype)


def _auto_tile_m(M, C, in_itemsize, out_itemsize, sublane, budget_bytes):
    """Largest row tile whose double-buffered in/out tiles (+ resident weight)
    fit inside `budget_bytes` of VMEM, rounded to the sublane granularity."""
    per_row = 2 * 4 * C * in_itemsize + 2 * C * out_itemsize   # dbl-buffered x + out
    weight_bytes = 2 * 4 * C * C * in_itemsize                 # conservative (x2)
    avail = max(budget_bytes - weight_bytes, per_row * sublane)
    tm = int(avail // per_row)
    tm = max(sublane, min(tm, 2048))
    tm = (tm // sublane) * sublane
    # Never use a tile larger than the (sublane-rounded) problem itself.
    tm = min(tm, _round_up(M, sublane))
    return max(tm, sublane)


def downsample(x, weights, *, tile_m=None, compute_dtype=None,
               vmem_budget_bytes=20 << 20):
    """Equivalent of Downsample.forward.

    x       : any shape whose flattened size is divisible by C*4
              (e.g. channels-last (B, L, C) with L % 4 == 0).
    weights : (C, C, 4) parameter (torch layout).
    Returns : (M, C) with M = x.size // (C*4), dtype == x.dtype.
    """
    C = weights.shape[0]
    assert weights.shape == (C, C, 4)
    out_dtype = x.dtype

    x2 = x.reshape(-1, C * 4)                 # torch: x.view(-1, C*4)
    w = weights.reshape(C, C * 4).T           # torch: weights.flatten(1).t() -> (4C, C)
    if compute_dtype is not None:
        x2 = x2.astype(compute_dtype)
        w = w.astype(compute_dtype)

    M = x2.shape[0]
    in_itemsize = jnp.dtype(x2.dtype).itemsize
    out_itemsize = jnp.dtype(out_dtype).itemsize
    # Sublane granularity for the second-to-last block dim: 8 (f32), 16 (bf16), 32 (i8/fp8).
    sublane = max(8, 32 // in_itemsize)

    if tile_m is None:
        tm = _auto_tile_m(M, C, in_itemsize, out_itemsize, sublane, vmem_budget_bytes)
    else:
        tm = max(sublane, min(_round_up(tile_m, sublane), _round_up(M, sublane)))

    m_pad = _round_up(M, tm)
    if m_pad != M:
        x2 = jnp.pad(x2, ((0, m_pad - M), (0, 0)))
    grid = (m_pad // tm,)

    # Per-step VMEM footprint: double-buffered x & out tiles + weight
    # (counted double-buffered to be conservative) + headroom.
    footprint = (2 * tm * 4 * C + 2 * 4 * C * C) * in_itemsize + 2 * tm * C * out_itemsize
    vmem_limit = min(max(int(1.25 * footprint) + (1 << 20), 32 << 20), 48 << 20)

    cost = pl.CostEstimate(
        flops=2 * m_pad * C * (4 * C),
        transcendentals=0,
        bytes_accessed=(m_pad * 4 * C + 4 * C * C) * in_itemsize
        + m_pad * C * out_itemsize,
    )

    out = pl.pallas_call(
        _downsample_kernel,
        out_shape=jax.ShapeDtypeStruct((m_pad, C), out_dtype),
        grid=grid,
        in_specs=[
            pl.BlockSpec((tm, 4 * C), lambda i: (i, 0)),    # streamed row tiles of x
            pl.BlockSpec((4 * C, C), lambda i: (0, 0)),     # weight resident in VMEM
        ],
        out_specs=pl.BlockSpec((tm, C), lambda i: (i, 0)),
        compiler_params=pltpu.CompilerParams(
            dimension_semantics=("parallel",),
            vmem_limit_bytes=vmem_limit,
        ),
        cost_estimate=cost,
    )(x2, w)

    if m_pad != M:
        out = out[:M]
    return out
    # TODO(synk): if production C < 128 and this op is not fused downstream, a
    # lane-dense output repack (multiple-of-128 last dim) would avoid masked
    # vst.msk partial stores; skipped here since x-reads dominate HBM traffic 4:1.


def init_weights(key, channels, dtype=jnp.float32):
    """Xavier-uniform matching torch.nn.init.xavier_uniform_ on (C, C, 4):
    fan_in = fan_out = C * 4."""
    fan = channels * 4
    bound = math.sqrt(6.0 / (fan + fan))
    return jax.random.uniform(
        key, (channels, channels, 4), dtype=dtype, minval=-bound, maxval=bound
    )


if __name__ == "__main__":
    key = jax.random.PRNGKey(0)
    kx, kw, kx2 = jax.random.split(key, 3)

    channels = 32

    def reference(xv, wv):
        return xv.reshape(-1, channels * 4) @ wv.reshape(channels, channels * 4).T

    # --- Small case (M=4, single padded tile, auto tile size) ----------------
    B, L = 2, 8  # L % 4 == 0  ->  M = B*L/4 = 4
    x = jax.random.normal(kx, (B, L, channels), dtype=jnp.float32)
    weights = init_weights(kw, channels)

    out = jax.block_until_ready(downsample(x, weights))
    ref = reference(x, weights)
    assert out.shape == (B * L // 4, channels)
    assert jnp.allclose(out, ref, atol=1e-5, rtol=1e-5)

    # --- Multi-tile case with a partial last tile (grid + padding path) ------
    B2, L2 = 2, 88  # M = 44; tile_m=16 -> 3 grid steps, last tile padded
    x_big = jax.random.normal(kx2, (B2, L2, channels), dtype=jnp.float32)
    out_big = jax.block_until_ready(downsample(x_big, weights, tile_m=16))
    ref_big = reference(x_big, weights)
    assert out_big.shape == (B2 * L2 // 4, channels)
    assert jnp.allclose(out_big, ref_big, atol=1e-5, rtol=1e-5)

    # --- bf16 compute path (halves HBM traffic; f32 MXU accumulation) --------
    out_bf16 = jax.block_until_ready(
        downsample(x_big, weights, tile_m=16, compute_dtype=jnp.bfloat16)
    )
    assert out_bf16.shape == ref_big.shape
    assert jnp.allclose(out_bf16.astype(jnp.float32), ref_big, atol=1e-1, rtol=1e-1)

    print("KERNEL_OK")
</pallas_src>

<mosaic_0001>
module attributes {stable_mosaic.version = 11 : i64} {
  func.func @_downsample_kernel(%arg0: i32, %arg1: memref<8x128xf32, #tpu.memory_space<vmem>>, %arg2: memref<128x32xf32, #tpu.memory_space<vmem>>, %arg3: memref<8x32xf32, #tpu.memory_space<vmem>>) attributes {dimension_semantics = [#tpu.dimension_semantics<parallel>], iteration_bounds = array<i64: 1>, scalar_prefetch = 0 : i64, scratch_operands = 0 : i64, tpu.core_type = #tpu.core_type<tc>, window_params = [{transform_indices = @transform_0, window_bounds = array<i64: 8, 128>}, {pipeline_mode = #tpu.pipeline_mode<synchronous>, transform_indices = @transform_1, window_bounds = array<i64: 128, 32>}, {transform_indices = @transform_2, window_bounds = array<i64: 8, 32>}]} {
    %c0 = arith.constant 0 : index
    %c0_0 = arith.constant 0 : index
    %0 = vector.load %arg1[%c0, %c0_0] : memref<8x128xf32, #tpu.memory_space<vmem>>, vector<8x128xf32>
    %c0_1 = arith.constant 0 : index
    %c0_2 = arith.constant 0 : index
    %1 = vector.load %arg2[%c0_1, %c0_2] : memref<128x32xf32, #tpu.memory_space<vmem>>, vector<128x32xf32>
    %cst = arith.constant dense<0.000000e+00> : vector<8x32xf32>
    %2 = tpu.matmul %0, %1, %cst {dimension_numbers = #tpu.dot_dimension_numbers<[1], [0], [0], [1], [0, 0, 1, 1], [], []>} : vector<8x128xf32>, vector<128x32xf32>, vector<8x32xf32> -> vector<8x32xf32>
    %c0_3 = arith.constant 0 : index
    %c0_4 = arith.constant 0 : index
    %3 = vector.load %arg3[%c0_3, %c0_4] : memref<8x32xf32, #tpu.memory_space<vmem>>, vector<8x32xf32>
    tpu.vector_store %arg3[%c0_3, %c0_4], %2 {strides = array<i32>} : memref<8x32xf32, #tpu.memory_space<vmem>>, vector<8x32xf32>,
    return
  }
  func.func @transform_0(%arg0: i32) -> (i32, i32) {
    %c0_i32 = arith.constant 0 : i32
    %c0_i32_0 = arith.constant 0 : i32
    return %arg0, %c0_i32 : i32, i32
  }
  func.func @transform_1(%arg0: i32) -> (i32, i32) {
    %c0_i32 = arith.constant 0 : i32
    %c0_i32_0 = arith.constant 0 : i32
    %c0_i32_1 = arith.constant 0 : i32
    return %c0_i32, %c0_i32_0 : i32, i32
  }
  func.func @transform_2(%arg0: i32) -> (i32, i32) {
    %c0_i32 = arith.constant 0 : i32
    %c0_i32_0 = arith.constant 0 : i32
    return %arg0, %c0_i32 : i32, i32
  }
}

</mosaic_0001>

<bundles_post_ra>
// kernel: tpu_custom_call.1
= control target key start
LH: loop header
LB: loop body
LE: loop exit
PB: predicated region body
PF: predicated region fallthrough
CT: control target
= control target key end

     0   :  { %v192_v1 = vmov 0.0   ;;  %vm193_vm0 = vmmov 0   ;;  %s264_s0 = inlined_call_operand.vmem [shape: f32[8,128], index: 0, kind: input, shape index: {}]   ;;  %s265_s1 = inlined_call_operand.vmem [shape: f32[128,32], index: 1, kind: input, shape index: {}]   ;;  %s266_s2 = inlined_call_operand.hbm [shape: f32[8,32], index: 2, kind: output, shape index: {}]  }
   0x1   :  { %v28_v0 = vld [vmem:[%s265_s1 + $0x78] sm:$0xff]  ;;  %132 = vmatprep.subr.mxu0 %v192_v1  ;;  %v27_v2 = vld [vmem:[%s265_s1 + $0x70] sm:$0xff]  ;;  %164 = vmatprep.mubr.msk.f32.mxu0 %vm193_vm0, %v192_v1  ;;  %v26_v3 = vld [vmem:[%s265_s1 + $0x68] sm:$0xff] }
   0x2   :  { %133 = vmatpush3.msra.mxu0 %v28_v0  ;;  %v25_v4 = vld [vmem:[%s265_s1 + $0x60] sm:$0xff] }
   0x3   :  { %134 = vmatprep.subr.mxu0 %v192_v1 }
   0x4   :  { %135 = vmatpush3.msra.mxu0 %v27_v2 }
   0x5   :  { %136 = vmatprep.subr.mxu0 %v192_v1 }
   0x6   :  { %7 = vsyncpa [#allocation3], 0  ;;  %137 = vmatpush3.msra.mxu0 %v26_v3  ;;  %v24_v5 = vld [vmem:[%s265_s1 + $0x58] sm:$0xff]  ;;  %v23_v6 = vld [vmem:[%s265_s1 + $0x50] sm:$0xff]  ;;  %s194_s15 = smov [#allocation2]   ;;  %vm99_vm1 = vcmask 261120  }
   0x7   :  { %138 = vmatprep.subr.mxu0 %v192_v1  ;;  %v22_v7 = vld [vmem:[%s265_s1 + $0x48] sm:$0xff]  ;;  %v21_v8 = vld [vmem:[%s265_s1 + $0x40] sm:$0xff]  ;;  %v20_v9 = vld [vmem:[%s265_s1 + $0x38] sm:$0xff]  ;;  %s107_s16 = sshll.u32 %s194_s15, 4  ;;  %s108_s16 = int_to_ptr.vmem [resolvable:$true] %s107_s16 }
   0x8   :  { %139 = vmatpush3.msra.mxu0 %v25_v4  ;;  %v19_v10 = vld [vmem:[%s265_s1 + $0x30] sm:$0xff]  ;;  %v18_v11 = vld [vmem:[%s265_s1 + $0x28] sm:$0xff]  ;;  %v17_v12 = vld [vmem:[%s265_s1 + $0x20] sm:$0xff]  ;;  %s170_s17 = scalar_lea.vmem %s108_s16, 128  ;;  %p175_p1 = scmp.lt.s32.totalorder %s108_s16, %s108_s16 }
   0x9   :  { %140 = vmatprep.subr.mxu0 %v192_v1  ;;  %v16_v13 = vld [vmem:[%s265_s1 + $0x18] sm:$0xff]  ;;  %v15_v14 = vld [vmem:[%s265_s1 + $0x10] sm:$0xff]  ;;  %v14_v15 = vld [vmem:[%s265_s1 + $0x8] sm:$0xff]  ;;  %p171_p0 = scmp.ne.s32.totalorder %s108_s16, %s170_s17  ;;  %p176_p2 = scmp.lt.s32.totalorder %s170_s17, %s170_s17 }
   0xa   :  { %141 = vmatpush3.msra.mxu0 %v24_v5  ;;  %v13_v16 = vld [vmem:[%s265_s1] sm:$0xff] }
   0xb   :  { %142 = vmatprep.subr.mxu0 %v192_v1  ;;  %v12_v17 = vld [vmem:[%s264_s0] sm:$0xff]  ;;  %p177_p3 = por %p176_p2, %p175_p1 }
   0xc   :  { %143 = vmatpush3.msra.mxu0 %v23_v6 }
   0xd   :  { %144 = vmatprep.subr.mxu0 %v192_v1  ;;  %p178_p4 = pnand %p177_p3, %p171_p0 }
   0xe   :  { %145 = vmatpush3.msra.mxu0 %v22_v7 }
   0xf   :  { %146 = vmatprep.subr.mxu0 %v192_v1 }
  0x10   :  { %147 = vmatpush3.msra.mxu0 %v21_v8 }
  0x11   :  { %148 = vmatprep.subr.mxu0 %v192_v1 }
  0x12   :  { %149 = vmatpush3.msra.mxu0 %v20_v9 }
  0x13   :  { %150 = vmatprep.subr.mxu0 %v192_v1 }
  0x14   :  { %151 = vmatpush3.msra.mxu0 %v19_v10 }
  0x15   :  { %152 = vmatprep.subr.mxu0 %v192_v1 }
  0x16   :  { %153 = vmatpush3.msra.mxu0 %v18_v11 }
  0x17   :  { %154 = vmatprep.subr.mxu0 %v192_v1 }
  0x18   :  { %155 = vmatpush3.msra.mxu0 %v17_v12 }
  0x19   :  { %156 = vmatprep.subr.mxu0 %v192_v1 }
  0x1a   :  { %157 = vmatpush3.msra.mxu0 %v16_v13 }
  0x1b   :  { %158 = vmatprep.subr.mxu0 %v192_v1 }
  0x1c   :  { %159 = vmatpush3.msra.mxu0 %v15_v14 }
  0x1d   :  { %160 = vmatprep.subr.mxu0 %v192_v1 }
  0x1e   :  { %161 = vmatpush3.msra.mxu0 %v14_v15 }
  0x1f   :  { %162 = vmatprep.subr.mxu0 %v192_v1 }
  0x20   :  { %163 = vmatpush3.msra.mxu0 %v13_v16 }
  0x21   :  { %165 = vmatmul.mubr.f32.vlgmr.msra.gmra.mxu0 %v12_v17 }
  0xe1   :  { %v95_v18 = vpop.f32.mrf.mxu0 }
  0xe2   :  { %100 = vst.msk [vmem:[#allocation2] sm:$0xff] %vm99_vm1, %v95_v18 }
  0xe3   :  { %v166_v19 = vpop.f32.mrf.mxu0 }
  0xe4   :  { %181 = shalt.err (!%p178_p4)
}
  0xe5   :  { %110 = dma.vmem_to_hbm [thread:$0]  %s108_s16, 128, %s266_s2, [#allocation3]  }
  0xe6   :  { %190 = dma.done.wait [#allocation3], 128  }
  0xe7   :  { %191 = vsyncadd [#allocation3], 4294967168 }
  0xe8   :  { %114 = vsyncpa [#allocation3], 1 }

</bundles_post_ra>
